<compile_context>
chip_gen: v7x
topology: tpu7x:2x2x1
jax: 0.10.0
libtpu: 0.0.40
codegen_flags: <defaults>
</compile_context>

<pallas_src>
import jax
import jax.numpy as jnp
from jax.experimental import pallas as pl
from jax.experimental.pallas import tpu as pltpu


def _chunk_plan(leading: int, nbytes: int, *, max_chunks: int, min_chunk_bytes: int):
    """Static (start, size) slices along the leading dim for the DMA chunks."""
    if leading <= 1:
        return [(0, leading)]
    k = min(max_chunks, leading, max(1, nbytes // max(1, min_chunk_bytes)))
    k = max(1, k)
    base, rem = divmod(leading, k)
    chunks = []
    start = 0
    for i in range(k):
        size = base + (1 if i < rem else 0)
        chunks.append((start, size))
        start += size
    return chunks


def _make_identity_dma_kernel(chunks):
    """Kernel copying x->o as len(chunks) concurrent HBM->HBM DMAs."""

    def kernel(x_hbm_ref, o_hbm_ref, sems):
        copies = []
        # Issue every descriptor first (all outstanding simultaneously) ...
        for i, (start, size) in enumerate(chunks):
            cp = pltpu.make_async_copy(
                x_hbm_ref.at[pl.ds(start, size)],
                o_hbm_ref.at[pl.ds(start, size)],
                sems.at[i],
            )
            cp.start()
            copies.append(cp)
        # ... then wait them all.
        for cp in copies:
            cp.wait()

    return kernel


def identity_copy(
    x: jax.Array,
    *,
    max_chunks: int = 8,
    min_chunk_bytes: int = 1 << 20,
) -> jax.Array:
    """Materialized identity: fresh buffer equal to x via chunked HBM->HBM DMA."""
    if x.size == 0 or x.ndim == 0:
        # Nothing to DMA (or 0-d scalar); identity semantics preserved by x itself.
        return x

    nbytes = x.size * x.dtype.itemsize
    chunks = _chunk_plan(
        x.shape[0], nbytes, max_chunks=max_chunks, min_chunk_bytes=min_chunk_bytes
    )
    n_chunks = len(chunks)

    return pl.pallas_call(
        _make_identity_dma_kernel(chunks),
        out_shape=jax.ShapeDtypeStruct(x.shape, x.dtype),
        in_specs=[pl.BlockSpec(memory_space=pl.ANY)],   # stay in HBM, no auto-DMA
        out_specs=pl.BlockSpec(memory_space=pl.ANY),    # stay in HBM, kernel DMAs into it
        scratch_shapes=[pltpu.SemaphoreType.DMA((n_chunks,))],
        cost_estimate=pl.CostEstimate(
            flops=0, transcendentals=0, bytes_accessed=2 * nbytes),
    )(x)


def identity_layer(x: jax.Array, *, materialize: bool = False) -> jax.Array:
    """Pallas/JAX equivalent of IdentityLayer.forward.

    Default (materialize=False): return x unchanged — zero cost, identical to
    the PyTorch module (which returns the input tensor object).
    materialize=True produces a distinct output buffer via a chunked
    HBM->HBM DMA Pallas kernel.
    """
    if not materialize:
        return x
    return identity_copy(x)


if __name__ == "__main__":
    # IdentityLayer(in_channels=4) has no parameters; in_channels is only stored.
    key = jax.random.PRNGKey(0)
    x = jax.random.normal(key, (2, 4, 16, 16), dtype=jnp.float32)  # NCHW

    # Zero-cost path (module semantics: return x).
    y_fast = jax.block_until_ready(identity_layer(x))

    # Pallas kernel path (materialized copy; single descriptor at this size).
    y_copy = jax.block_until_ready(identity_layer(x, materialize=True))

    # Exercise the multi-descriptor (chunked) path explicitly at small size.
    y_chunked = jax.block_until_ready(identity_copy(x, min_chunk_bytes=1024))

    assert y_fast.shape == x.shape and y_fast.dtype == x.dtype
    assert y_copy.shape == x.shape and y_copy.dtype == x.dtype
    assert y_chunked.shape == x.shape and y_chunked.dtype == x.dtype
    assert bool(jnp.all(y_fast == x))
    assert bool(jnp.all(y_copy == x))
    assert bool(jnp.all(y_chunked == x))
    print("KERNEL_OK")
</pallas_src>

<mosaic_0001>
module attributes {stable_mosaic.version = 11 : i64} {
  func.func @kernel(%arg0: memref<2x4x16x16xf32, #tpu.memory_space<any>>, %arg1: memref<2x4x16x16xf32, #tpu.memory_space<any>>, %arg2: memref<1x!tpu.dma_semaphore, #tpu.memory_space<semaphore_mem>>) attributes {dimension_semantics = [], scalar_prefetch = 0 : i64, scratch_operands = 1 : i64, tpu.core_type = #tpu.core_type<tc>} {
    %c0_i32 = arith.constant 0 : i32
    %c0_i32_0 = arith.constant 0 : i32
    %c0_i32_1 = arith.constant 0 : i32
    %c0_i32_2 = arith.constant 0 : i32
    %c0_i32_3 = arith.constant 0 : i32
    %0 = tpu.memref_slice %arg0[%c0_i32_0, %c0_i32_1, %c0_i32_2, %c0_i32_3] : memref<2x4x16x16xf32, #tpu.memory_space<any>> -> memref<2x4x16x16xf32, #tpu.memory_space<any>>
    %c0_i32_4 = arith.constant 0 : i32
    %c0_i32_5 = arith.constant 0 : i32
    %c0_i32_6 = arith.constant 0 : i32
    %c0_i32_7 = arith.constant 0 : i32
    %1 = tpu.memref_slice %arg1[%c0_i32_4, %c0_i32_5, %c0_i32_6, %c0_i32_7] : memref<2x4x16x16xf32, #tpu.memory_space<any>> -> memref<2x4x16x16xf32, #tpu.memory_space<any>>
    %2 = tpu.memref_slice %arg2[%c0_i32] : memref<1x!tpu.dma_semaphore, #tpu.memory_space<semaphore_mem>> -> memref<1x!tpu.dma_semaphore, #tpu.memory_space<semaphore_mem>>
    %3 = tpu.memref_squeeze %2 : memref<1x!tpu.dma_semaphore, #tpu.memory_space<semaphore_mem>> -> memref<!tpu.dma_semaphore, #tpu.memory_space<semaphore_mem>>
    tpu.enqueue_dma source(%0 : memref<2x4x16x16xf32, #tpu.memory_space<any>>) target(%1 : memref<2x4x16x16xf32, #tpu.memory_space<any>>) target_semaphore(%3 : memref<!tpu.dma_semaphore, #tpu.memory_space<semaphore_mem>>)
    %c0_i32_8 = arith.constant 0 : i32
    %c0_i32_9 = arith.constant 0 : i32
    %c0_i32_10 = arith.constant 0 : i32
    %c0_i32_11 = arith.constant 0 : i32
    %c0_i32_12 = arith.constant 0 : i32
    %4 = tpu.memref_slice %arg0[%c0_i32_9, %c0_i32_10, %c0_i32_11, %c0_i32_12] : memref<2x4x16x16xf32, #tpu.memory_space<any>> -> memref<2x4x16x16xf32, #tpu.memory_space<any>>
    %c0_i32_13 = arith.constant 0 : i32
    %c0_i32_14 = arith.constant 0 : i32
    %c0_i32_15 = arith.constant 0 : i32
    %c0_i32_16 = arith.constant 0 : i32
    %5 = tpu.memref_slice %arg1[%c0_i32_13, %c0_i32_14, %c0_i32_15, %c0_i32_16] : memref<2x4x16x16xf32, #tpu.memory_space<any>> -> memref<2x4x16x16xf32, #tpu.memory_space<any>>
    %6 = tpu.memref_slice %arg2[%c0_i32_8] : memref<1x!tpu.dma_semaphore, #tpu.memory_space<semaphore_mem>> -> memref<1x!tpu.dma_semaphore, #tpu.memory_space<semaphore_mem>>
    %7 = tpu.memref_squeeze %6 : memref<1x!tpu.dma_semaphore, #tpu.memory_space<semaphore_mem>> -> memref<!tpu.dma_semaphore, #tpu.memory_space<semaphore_mem>>
    tpu.wait_dma2 semaphore(%7 : memref<!tpu.dma_semaphore, #tpu.memory_space<semaphore_mem>>) src(%4 : memref<2x4x16x16xf32, #tpu.memory_space<any>>) dst(%5 : memref<2x4x16x16xf32, #tpu.memory_space<any>>)
    return
  }
}

</mosaic_0001>

<bundles_post_ra>
// kernel: tpu_custom_call.1
= control target key start
LH: loop header
LB: loop body
LE: loop exit
PB: predicated region body
PF: predicated region fallthrough
CT: control target
= control target key end

     0   :  { %s36_s6 = smov [#allocation2]   ;;  %s37_s7 = smov [#allocation3]   ;;  %s55_s0 = inlined_call_operand.hbm [shape: f32[2,4,16,16], index: 0, kind: input, shape index: {}]   ;;  %s56_s1 = inlined_call_operand.hbm [shape: f32[2,4,16,16], index: 1, kind: output, shape index: {}]  }
   0x1   :  { %s38_s8 = smov 0  }
   0x2   :  { %18 = dma.general %s55_s0, 2048, %s56_s1, %s36_s6, %s37_s7, [#allocation4], %s38_s8, 0  }
   0x3   :  { %34 = dma.done.wait [#allocation2], 2048 }
   0x4   :  { %35 = vsyncadd [#allocation2], 4294965248 }
   0x5   :  { %24 = vsyncmov [#allocation2] }
   0x8   :  { %s25_s13 = vpop.sfrf %24 }
   0x9   :  { %p30_p0 = scmp.ne.s32.totalorder %s25_s13, 0 }
   0xb   :  { %29 = shalt.err (%p30_p0)  }

</bundles_post_ra>
